<compile_context>
chip_gen: v6e
topology: v6e:2x2x1
jax: 0.10.0
libtpu: 0.0.40
codegen_flags: <defaults>
</compile_context>

<pallas_src>
import jax
import jax.numpy as jnp
from jax import lax
from jax.experimental import pallas as pl
from jax.experimental.pallas import tpu as pltpu


# ---------------------------------------------------------------- pass 1: pool
def _pool_kernel(x_ref, sum_ref):
    # x_ref:   (1, C, Ts) in native dtype
    # sum_ref: (1, C, 1)  f32, resident accumulator across the S axis
    @pl.when(pl.program_id(1) == 0)
    def _():
        sum_ref[...] = jnp.zeros_like(sum_ref)

    sum_ref[...] += jnp.sum(x_ref[...].astype(jnp.float32), axis=-1,
                            keepdims=True)


# ----------------------------------------------------- excitation MLP (batched)
def _make_excite_kernel(inv_s):
    def _excite_kernel(pooled_ref, w1_ref, b1_ref, w2_ref, b2_ref, scale_ref):
        # pooled_ref: (B, C, 1) f32 sums; w1: (C_red, C); b1: (1, C_red)
        # w2: (C, C_red); b2: (1, C); scale_ref: (B, C, 1) f32
        shp = pooled_ref.shape
        p = pooled_ref[...].reshape(shp[0], shp[1]) * inv_s          # (B, C) mean
        # p @ w1.T  -- contraction on the last dims, no transposes materialized.
        h = lax.dot_general(p, w1_ref[...], (((1,), (1,)), ((), ())),
                            preferred_element_type=jnp.float32) + b1_ref[...]
        h = h * jax.nn.sigmoid(h)                                     # Swish
        s = lax.dot_general(h, w2_ref[...], (((1,), (1,)), ((), ())),
                            preferred_element_type=jnp.float32) + b2_ref[...]
        scale_ref[...] = jax.nn.sigmoid(s).reshape(scale_ref.shape)   # (B, C, 1)
    return _excite_kernel


# --------------------------------------------------------------- pass 2: scale
def _scale_kernel(x_ref, scale_ref, o_ref):
    # x_ref: (1, C, Ts) native dtype; scale_ref: (1, C, 1) f32; o_ref: (1, C, Ts)
    o_ref[...] = x_ref[...] * scale_ref[...].astype(o_ref.dtype)


# ------------------------------------------------------------------- tiling
def _pick_s_tile(S, C, itemsize, max_tile_bytes):
    """Largest S tile that is a multiple of 128, divides S, and keeps one
    (1, C, Ts) block under `max_tile_bytes` (so ~4 double-buffered blocks fit
    every generation's default scoped VMEM)."""
    max_ts = max(128, max_tile_bytes // (C * itemsize))
    if S <= max_ts:
        return S
    t = (max_ts // 128) * 128
    while t >= 128:
        if S % t == 0:
            return t
        t -= 128
    # TODO(synk): pad ragged S (no multiple-of-128 divisor under budget); fall
    # back to a single full-S block.
    return S


# -------------------------------------------------------------------- wrapper
def squeeze_excitation_3d(x, w1, b1, w2, b2, *, max_tile_bytes=2 * 1024 * 1024):
    """x: (B, C, H, W, D); w1: (C_red, C); b1: (C_red,); w2: (C, C_red); b2: (C,).
    Output has the same dtype as x."""
    B, C, H, W, D = x.shape
    S = H * W * D
    C_red = w1.shape[0]

    x_flat = x.reshape(B, C, S)                       # no dtype cast: native I/O
    ts = _pick_s_tile(S, C, jnp.dtype(x.dtype).itemsize, max_tile_bytes)
    n_s = S // ts

    # --- pass 1: per-channel sums (B, C, 1), accumulated in f32 -------------
    pooled_sum = pl.pallas_call(
        _pool_kernel,
        out_shape=jax.ShapeDtypeStruct((B, C, 1), jnp.float32),
        grid_spec=pltpu.PrefetchScalarGridSpec(
            num_scalar_prefetch=0,
            grid=(B, n_s),                           # reduction axis last
            in_specs=[pl.BlockSpec((1, C, ts), lambda b, s: (b, 0, s))],
            out_specs=pl.BlockSpec((1, C, 1), lambda b, s: (b, 0, 0)),
        ),
        compiler_params=pltpu.CompilerParams(
            dimension_semantics=("parallel", "arbitrary")),
    )(x_flat)

    # --- excitation MLP, batched over B (single grid-less call) -------------
    w1f = w1.astype(jnp.float32)
    w2f = w2.astype(jnp.float32)
    b1r = b1.reshape(1, C_red).astype(jnp.float32)
    b2r = b2.reshape(1, C).astype(jnp.float32)
    scale = pl.pallas_call(
        _make_excite_kernel(1.0 / S),
        out_shape=jax.ShapeDtypeStruct((B, C, 1), jnp.float32),
    )(pooled_sum, w1f, b1r, w2f, b2r)

    # --- pass 2: broadcast scale over spatial positions, fully parallel -----
    out_flat = pl.pallas_call(
        _scale_kernel,
        out_shape=jax.ShapeDtypeStruct((B, C, S), x.dtype),
        grid_spec=pltpu.PrefetchScalarGridSpec(
            num_scalar_prefetch=0,
            grid=(B, n_s),
            in_specs=[
                pl.BlockSpec((1, C, ts), lambda b, s: (b, 0, s)),
                pl.BlockSpec((1, C, 1), lambda b, s: (b, 0, 0)),
            ],
            out_specs=pl.BlockSpec((1, C, ts), lambda b, s: (b, 0, s)),
        ),
        compiler_params=pltpu.CompilerParams(
            dimension_semantics=("parallel", "parallel")),
    )(x_flat, scale)

    return out_flat.reshape(B, C, H, W, D)


# ------------------------------------------------------------------ reference
def _reference(x, w1, b1, w2, b2):
    B, C = x.shape[:2]
    xf = x.astype(jnp.float32)
    pooled = xf.reshape(B, C, -1).mean(-1)            # (B, C)
    h = pooled @ w1.T + b1
    h = h * jax.nn.sigmoid(h)                         # Swish
    scale = jax.nn.sigmoid(h @ w2.T + b2)             # (B, C)
    return xf * scale.reshape(B, C, 1, 1, 1)


if __name__ == "__main__":
    key = jax.random.PRNGKey(0)
    B, C, H, W, D = 2, 8, 8, 8, 4                     # S = 256
    factor = 4
    C_red = C // factor

    kx, k1, k2, k3, k4 = jax.random.split(key, 5)
    x = jax.random.normal(kx, (B, C, H, W, D), dtype=jnp.float32)

    bound1 = 1.0 / (C ** 0.5)
    bound2 = 1.0 / (C_red ** 0.5)
    w1 = jax.random.uniform(k1, (C_red, C), minval=-bound1, maxval=bound1)
    b1 = jax.random.uniform(k2, (C_red,), minval=-bound1, maxval=bound1)
    w2 = jax.random.uniform(k3, (C, C_red), minval=-bound2, maxval=bound2)
    b2 = jax.random.uniform(k4, (C,), minval=-bound2, maxval=bound2)

    ref = _reference(x, w1, b1, w2, b2)

    # f32 input, single S block (default tile budget).
    out = jax.block_until_ready(squeeze_excitation_3d(x, w1, b1, w2, b2))
    assert out.shape == (B, C, H, W, D) and out.dtype == x.dtype
    assert jnp.allclose(out, ref, atol=1e-5, rtol=1e-5), "f32 mismatch"

    # Exercise the S-tiled accumulation path (tiny tile budget -> Ts=128, nS=2).
    out_tiled = jax.block_until_ready(
        squeeze_excitation_3d(x, w1, b1, w2, b2, max_tile_bytes=4096))
    assert jnp.allclose(out_tiled, ref, atol=1e-5, rtol=1e-5), "tiled mismatch"

    # Native bf16 I/O: output stays bf16, pooling/FC accumulate in f32.
    x_bf16 = x.astype(jnp.bfloat16)
    out_bf16 = jax.block_until_ready(
        squeeze_excitation_3d(x_bf16, w1, b1, w2, b2))
    assert out_bf16.dtype == jnp.bfloat16
    ref_bf16 = _reference(x_bf16, w1, b1, w2, b2)
    assert jnp.allclose(out_bf16.astype(jnp.float32), ref_bf16,
                        atol=5e-2, rtol=5e-2), "bf16 mismatch"

    print("KERNEL_OK")
</pallas_src>

<mosaic_0001>
module attributes {stable_mosaic.version = 11 : i64} {
  func.func @_pool_kernel(%arg0: i32, %arg1: i32, %arg2: memref<1x8x256xf32, #tpu.memory_space<vmem>>, %arg3: memref<1x8x1xf32, #tpu.memory_space<vmem>>) attributes {dimension_semantics = [#tpu.dimension_semantics<parallel>, #tpu.dimension_semantics<arbitrary>], iteration_bounds = array<i64: 2, 1>, scalar_prefetch = 0 : i64, scratch_operands = 0 : i64, tpu.core_type = #tpu.core_type<tc>, window_params = [{transform_indices = @transform_0, window_bounds = array<i64: 1, 8, 256>}, {transform_indices = @transform_1, window_bounds = array<i64: 1, 8, 1>}]} {
    %c0_i32 = arith.constant 0 : i32
    %0 = arith.cmpi eq, %arg1, %c0_i32 : i32
    %1 = arith.extui %0 : i1 to i32
    %c0_i32_0 = arith.constant 0 : i32
    %2 = arith.cmpi ne, %1, %c0_i32_0 : i32
    scf.if %2 {
      %cst_9 = arith.constant 0.000000e+00 : f32
      %9 = vector.broadcast %cst_9 : f32 to vector<1x8x1xf32>
      %c0_10 = arith.constant 0 : index
      %c0_11 = arith.constant 0 : index
      %c0_12 = arith.constant 0 : index
      %10 = vector.load %arg3[%c0_10, %c0_11, %c0_12] : memref<1x8x1xf32, #tpu.memory_space<vmem>>, vector<1x8x1xf32>
      tpu.vector_store %arg3[%c0_10, %c0_11, %c0_12], %9 {strides = array<i32>} : memref<1x8x1xf32, #tpu.memory_space<vmem>>, vector<1x8x1xf32>,
    } else {
    }
    %c0 = arith.constant 0 : index
    %c0_1 = arith.constant 0 : index
    %c0_2 = arith.constant 0 : index
    %3 = vector.load %arg3[%c0, %c0_1, %c0_2] : memref<1x8x1xf32, #tpu.memory_space<vmem>>, vector<1x8x1xf32>
    %c0_3 = arith.constant 0 : index
    %c0_4 = arith.constant 0 : index
    %c0_5 = arith.constant 0 : index
    %4 = vector.load %arg2[%c0_3, %c0_4, %c0_5] : memref<1x8x256xf32, #tpu.memory_space<vmem>>, vector<1x8x256xf32>
    %cst = arith.constant dense<0.000000e+00> : vector<1x8xf32>
    %5 = vector.multi_reduction <add>, %4, %cst [2] : vector<1x8x256xf32> to vector<1x8xf32>
    %6 = vector.shape_cast %5 : vector<1x8xf32> to vector<1x8x1xf32>
    %7 = arith.addf %3, %6 : vector<1x8x1xf32>
    %c0_6 = arith.constant 0 : index
    %c0_7 = arith.constant 0 : index
    %c0_8 = arith.constant 0 : index
    %8 = vector.load %arg3[%c0_6, %c0_7, %c0_8] : memref<1x8x1xf32, #tpu.memory_space<vmem>>, vector<1x8x1xf32>
    tpu.vector_store %arg3[%c0_6, %c0_7, %c0_8], %7 {strides = array<i32>} : memref<1x8x1xf32, #tpu.memory_space<vmem>>, vector<1x8x1xf32>,
    return
  }
  func.func @transform_0(%arg0: i32, %arg1: i32) -> (i32, i32, i32) {
    %c0_i32 = arith.constant 0 : i32
    %c0_i32_0 = arith.constant 0 : i32
    return %arg0, %c0_i32, %arg1 : i32, i32, i32
  }
  func.func @transform_1(%arg0: i32, %arg1: i32) -> (i32, i32, i32) {
    %c0_i32 = arith.constant 0 : i32
    %c0_i32_0 = arith.constant 0 : i32
    %c0_i32_1 = arith.constant 0 : i32
    return %arg0, %c0_i32, %c0_i32_0 : i32, i32, i32
  }
}

</mosaic_0001>

<bundles_post_ra>
// kernel: tpu_custom_call.1
= control target key start
LH: loop header
LB: loop body
LE: loop exit
PB: predicated region body
PF: predicated region fallthrough
CT: control target
= control target key end

     0   :  { %6 = vsyncpa [#allocation3], 0  ;;  %s502_s0 = inlined_call_operand.hbm [shape: f32[2,8,256], index: 0, kind: input, shape index: {}]   ;;  %s503_s1 = inlined_call_operand.vmem [shape: f32[2,8,1], index: 1, kind: output, shape index: {}]  }
   0x1   :  { %8 = vsyncpa [#allocation3 + $0x1], 0  ;;  %s402_s6 = smov 0   ;;  %s404_s7 = smov 0  }
   0x2   :  { %s406_s8 = smov 0   ;;  %s408_s9 = smov 0  }
   0x3   :  { %s410_s10 = smov 0   ;;  %s412_s11 = smov 0  }
   0x4 LB: > { %s241_s12 = sadd.s32 4294967295, %s388_s11   ;;  %s26_s13 = sadd.s32 1, %s384_s10  ;;  %s388_s11 = sphi %s412_s11, %s14_s11   ;;  %s384_s10 = sphi %s410_s10, %s511_s10   ;;  %s380_s9 = sphi %s408_s9, %s510_s9   ;;  %s376_s8 = sphi %s406_s8, %s509_s8   ;;  %s372_s7 = sphi %s404_s7, %s508_s7   ;;  %s368_s6 = sphi %s402_s6, %s507_s6  }
   0x5   : > { %p28_p0 = scmp.ge.s32.totalorder %s26_s13, 2  ;;  %s35_s14 = sadd.s32 1, %s376_s8 }
   0x6   : > { %p42_p1 = scmp.ne.s32.totalorder %s376_s8, %s372_s7  ;;  %p43_p2 = scmp.eq.s32.totalorder %s388_s11, 0 }
   0x7   : > { %s513_s13 = smov (%p28_p0, %s26_s13), 0  ;;  %p48_p4 = scmp.ne.s32.totalorder %s372_s7, %s368_s6 }
   0x8   : > { %p438_p3 = por %p43_p2, %p42_p1  ;;  %s30_s16 = ssub.s32 %s384_s10, %s513_s13 }
   0x9   : > { %p49_p5 = scmp.eq.s32.totalorder %s241_s12, 0  ;;  %p33_p6 = scmp.eq.s32.totalorder %s30_s16, 0 }
   0xa   : > { %p260_p8 = scmp.lt.s32.totalorder %s388_s11, 2  ;;  %s98_s19 = sand.u32 1, %s376_s8  }
   0xb   : > { %p445_p7 = por %p49_p5, %p48_p4  ;;  %s253_s20 = sshll.u32 %s384_s10, 8 }
   0xc   : > { %s451_s18 = scalar_select %p33_p6, %s376_s8, %s35_s14  }
   0xd   : > { %s245_s21 = sshll.u32 %s98_s19, 4  ;;  %s110_s24 = scalar_lea.hbm %s502_s0, %s253_s20 }
   0xe   : > { %s102_s25 = scalar_lea.vmem [#allocation2], %s245_s21  ;;  %p460_p9 = pnand %p260_p8, %p438_p3 }
   0xf   : > { %s112_s26 = sshll.u32 %s102_s25, 4  ;;  %p248_p10 = scmp.ge.s32.totalorder %s388_s11, 1  ;;  %s113_s26 = int_to_ptr.vmem [resolvable:$true] %s112_s26 }
  0x10   : > { %p117_p11 = scmp.lt.s32.totalorder %s388_s11, 3  ;;  %s99_s28 = scalar_lea.sflag [#allocation3], %s98_s19 }
  0x11   : > { %p312_p12 = pneg %p460_p9  ;;  %s323_s29 = scalar_lea.vmem %s113_s26, 256 }
  0x12   : > { %p324_p13 = scmp.ne.s32.totalorder %s113_s26, %s323_s29  ;;  %s390_s30 = smov [#allocation2]  }
  0x13   : > { %s328_s2 = sshll.u32 %s390_s30, 4  ;;  %s329_s2 = int_to_ptr.vmem [resolvable:$false] %s328_s2 }
  0x14   : > { %p326_p0 = pnand %p324_p13, %p312_p12  ;;  %s330_s3 = scalar_lea.vmem %s329_s2, 512 }
  0x15   : > { %p331_p2 = scmp.lt.s32.totalorder %s113_s26, %s329_s2  ;;  %p332_p3 = scmp.lt.s32.totalorder %s330_s3, %s323_s29 }
  0x16   : > { %p327_p1 = pneg %p326_p0 }
  0x17   : > { %p333_p4 = por %p332_p3, %p331_p2 }
  0x19   : > { %p334_p5 = pnand %p333_p4, %p327_p1 }
  0x1b   : > { %337 = shalt.err (!%p334_p5)
}
  0x1c   : > { %259 = dma.hbm_to_vmem [thread:$0]  (!%p460_p9), %s110_s24, 256, %s113_s26, %s99_s28  }
  0x1d   : > { %p118_p6 = pnand %p248_p10, %p117_p11 }
  0x1e   : > { %s123_s4 = sand.u32 (!%p118_p6), 1, %s372_s7  }
  0x1f   : > { %121 = sbr.rel (%p118_p6) target bundleno = 181 (0xb5), region = 24  ;;  %s249_s5 = sshll.u32 (!%p118_p6), %s123_s4, 4 }
  0x20   : > { %s124_s6 = scalar_lea.sflag (!%p118_p6), [#allocation3], %s123_s4  ;;  %s127_s12 = scalar_lea.vmem (!%p118_p6), [#allocation2], %s249_s5 }
  0x24   : > { %363 = dma.done.wait (%p445_p7), %s124_s6, 256  }
  0x25   : > { %365 = vsyncadd (%p445_p7), %s124_s6, 4294967040  ;;  %p146_p8 = scmp.lt.s32.totalorder %s380_s9, 1  ;;  %vm154_vm0 = vcmask 7168   ;;  %v391_v0 = vmov 0.0   ;;  %v157_v1 = vld [vmem:[%s127_s12] sm:$0xff]  ;;  %v158_v2 = vld [vmem:[%s127_s12 + $0x8] sm:$0xff] }
  0x26   : > { %v159_v3 = vadd.f32 %v158_v2, %v157_v1 }
  0x27   : > { %s515_s9 = smov (!%p146_p8, %s380_s9), 1 }
  0x28   : > { %s250_s14 = sshll.u32 %s515_s9, 3  ;;  %160 = vadd.xlane.f32.xlu0 %v159_v3 }
  0x29   : > { %s149_s19 = scalar_lea.vmem %s503_s1, %s250_s14 }
  0x2a   : > { %155 = vst.msk [vmem:[%s149_s19] sm:$0xff] %vm154_vm0, %v391_v0 }
  0x31   : > { %v156_v4 = vld [vmem:[%s149_s19] sm:$0xff] }
  0xb1   : > { %v161_v5 = vpop.xlane.xlu0 %160 }
  0xb2   : > { %v162_v6 = vadd.f32 %v161_v5, %v156_v4 }
  0xb4   : > { %164 = vst.msk [vmem:[%s149_s19] sm:$0xff] %vm154_vm0, %v162_v6 }
  0xb5 PF: > { %s14_s11 = sadd.s32 1, %s388_s11   ;;  %s507_s6 = smov %s372_s7 }
  0xb6   : > { %p11_p7 = scmp.ge.s32.totalorder %s14_s11, 4   ;;  %s508_s7 = smov %s376_s8 }
  0xb7   : > { %s509_s8 = smov %s451_s18  ;;  %s510_s9 = smov %s384_s10 }
  0xb8   : > { %s511_s10 = smov %s513_s13  ;;  %13 = sbr.rel (!%p11_p7) target bundleno = 4 (0x4), region = 68 }
  0xbd   :  { %184 = vsyncpa [#allocation3], 1 }
  0xbe   :  { %186 = vsyncpa [#allocation3 + $0x1], 1 }

</bundles_post_ra>
